<compile_context>
chip_gen: v6e
topology: v6e:2x2x1
jax: 0.10.0
libtpu: 0.0.40
codegen_flags: <defaults>
</compile_context>

<pallas_src>
import functools

import jax
import jax.numpy as jnp
from jax.experimental import pallas as pl
from jax.experimental.pallas import tpu as pltpu


_NEG_LARGE = -1e30  # bias for padded output lanes -> exp underflows to exactly 0


def _round_up(n, m):
    return ((n + m - 1) // m) * m


# --------------------------------------------------------------------------
# Kernel
# --------------------------------------------------------------------------
def _ff_kernel(x_ref, w1_ref, b1_ref, w2_ref, b2_ref, o_ref, acc_ref):
    # Grid: (batch_tiles [parallel], hidden_chunks [arbitrary, reduction]).
    # x_ref:  (tb, d_pad)    bf16   (resident across hidden axis)
    # w1_ref: (d_pad, hc)    bf16   b1_ref: (1, hc)    f32
    # w2_ref: (hc, d_pad)    bf16   b2_ref: (1, d_pad) f32 (-1e30 on pad lanes)
    # o_ref:  (tb, d_pad)           acc_ref: (tb, d_pad) f32 scratch
    j = pl.program_id(1)

    @pl.when(j == 0)
    def _():
        acc_ref[...] = jnp.zeros_like(acc_ref)

    # Linear 1 (+bias) + ReLU on this hidden chunk — bf16 operands, f32 acc.
    h = jnp.dot(x_ref[...], w1_ref[...], preferred_element_type=jnp.float32)
    h = jnp.maximum(h + b1_ref[...], 0.0)

    # Linear 2 partial contribution of this hidden chunk.
    acc_ref[...] += jnp.dot(h.astype(w2_ref.dtype), w2_ref[...],
                            preferred_element_type=jnp.float32)

    @pl.when(j == pl.num_programs(1) - 1)
    def _():
        # Bias (+ -1e30 on padded lanes) and numerically stable softmax in f32.
        y = acc_ref[...] + b2_ref[...]
        m = jnp.max(y, axis=-1, keepdims=True)
        e = jnp.exp(y - m)
        s = jnp.sum(e, axis=-1, keepdims=True)
        inv = pl.reciprocal(s, approx=True)  # EUP slot; rows sum to ~1
        o_ref[...] = (e * inv).astype(o_ref.dtype)


# --------------------------------------------------------------------------
# VMEM planning
# --------------------------------------------------------------------------
def _vmem_capacity():
    try:
        return int(pltpu.get_tpu_info().vmem_capacity_bytes)
    except Exception:
        return 64 << 20  # conservative (v7x per-TC) default


def _vmem_need(tb, d_pad, hc, out_bytes, wbuf):
    """Rough resident-VMEM estimate for one grid step."""
    return (
        2 * tb * d_pad * 2                    # x tiles (bf16, double-buffered)
        + 2 * tb * d_pad * out_bytes          # out tiles (double-buffered)
        + wbuf * 2 * d_pad * hc * 2           # W1 + W2 chunks (bf16)
        + wbuf * (hc + d_pad) * 4             # bias chunks (f32)
        + tb * d_pad * 4                      # f32 accumulator scratch
        + tb * hc * 4                         # live f32 hidden activations
        + 2 * tb * d_pad * 4                  # epilogue f32 temporaries
    )


@functools.lru_cache(maxsize=None)
def _buffered1_supported():
    """Probe (once) whether this JAX build accepts pipeline_mode=pl.Buffered(1)."""
    try:
        def k(x_ref, w_ref, o_ref):
            o_ref[...] = x_ref[...] + w_ref[...]
        f = pl.pallas_call(
            k,
            out_shape=jax.ShapeDtypeStruct((16, 128), jnp.float32),
            grid=(2,),
            in_specs=[
                pl.BlockSpec((8, 128), lambda i: (i, 0)),
                pl.BlockSpec((8, 128), lambda i: (0, 0),
                             pipeline_mode=pl.Buffered(1)),
            ],
            out_specs=pl.BlockSpec((8, 128), lambda i: (i, 0)),
        )
        jax.block_until_ready(
            f(jnp.zeros((16, 128), jnp.float32), jnp.zeros((8, 128), jnp.float32)))
        return True
    except Exception:
        return False


def _choose_hidden_plan(tb, d_pad, h_pad, out_bytes, budget):
    """Returns (hidden_chunk, single_buffer_weights)."""
    # 1) weights fully resident, default double-buffering (best on v5e/v6e).
    if _vmem_need(tb, d_pad, h_pad, out_bytes, 2) <= budget:
        return h_pad, False
    # 2) weights fully resident, single-buffered (halves weight VMEM; v7x).
    if (_vmem_need(tb, d_pad, h_pad, out_bytes, 1) <= budget
            and _buffered1_supported()):
        return h_pad, True
    # 3) stream hidden chunks (double-buffered so weight DMA hides behind MXU).
    hc = h_pad
    while hc > 128 and _vmem_need(tb, d_pad, hc, out_bytes, 2) > budget:
        hc = max(128, _round_up(hc // 2, 128))
    while h_pad % hc:            # hc must divide h_pad for the grid
        hc -= 128
    return hc, False


# --------------------------------------------------------------------------
# pallas_call builder (cached per configuration)
# --------------------------------------------------------------------------
@functools.lru_cache(maxsize=None)
def _make_call(B_pad, d_pad, h_pad, hc, tb, out_dtype_name,
               single_buffer_weights, vmem_limit):
    out_dtype = jnp.dtype(out_dtype_name)
    n_h = h_pad // hc

    w_kw = {}
    if single_buffer_weights:
        w_kw = dict(pipeline_mode=pl.Buffered(1))

    grid_spec = pltpu.PrefetchScalarGridSpec(
        num_scalar_prefetch=0,
        grid=(B_pad // tb, n_h),
        in_specs=[
            pl.BlockSpec((tb, d_pad), lambda i, j: (i, 0)),            # x tile
            pl.BlockSpec((d_pad, hc), lambda i, j: (0, j), **w_kw),    # W1 chunk
            pl.BlockSpec((1, hc), lambda i, j: (0, j), **w_kw),        # b1 chunk
            pl.BlockSpec((hc, d_pad), lambda i, j: (j, 0), **w_kw),    # W2 chunk
            pl.BlockSpec((1, d_pad), lambda i, j: (0, 0), **w_kw),     # b2
        ],
        out_specs=pl.BlockSpec((tb, d_pad), lambda i, j: (i, 0)),
        scratch_shapes=[pltpu.VMEM((tb, d_pad), jnp.float32)],
    )
    return pl.pallas_call(
        _ff_kernel,
        out_shape=jax.ShapeDtypeStruct((B_pad, d_pad), out_dtype),
        grid_spec=grid_spec,
        compiler_params=pltpu.CompilerParams(
            dimension_semantics=("parallel", "arbitrary"),
            vmem_limit_bytes=vmem_limit,
        ),
    )


# --------------------------------------------------------------------------
# Parameter preparation (done ONCE at load time, not per call)
# --------------------------------------------------------------------------
def prepare_ff_params(w1, b1, w2, b2):
    """w1: (d_ff, 2*d_ff); b1: (2*d_ff,); w2: (2*d_ff, d_ff); b2: (d_ff,).

    Weights are (in_features, out_features) — transposed vs PyTorch nn.Linear
    storage — so the kernel computes x @ W + b == x @ W_pt.T + b_pt.
    Pads features to 128 multiples (lane-dense) and casts weights to bf16.
    """
    d_ff, d_hid = w1.shape
    d_pad = _round_up(d_ff, 128)
    h_pad = _round_up(d_hid, 128)
    w1_p = jnp.pad(w1, ((0, d_pad - d_ff), (0, h_pad - d_hid))).astype(jnp.bfloat16)
    w2_p = jnp.pad(w2, ((0, h_pad - d_hid), (0, d_pad - d_ff))).astype(jnp.bfloat16)
    b1_p = jnp.pad(b1.astype(jnp.float32), (0, h_pad - d_hid)).reshape(1, h_pad)
    b2_p = jnp.full((1, d_pad), _NEG_LARGE, jnp.float32)
    b2_p = b2_p.at[0, :d_ff].set(b2.astype(jnp.float32))
    return dict(w1=w1_p, b1=b1_p, w2=w2_p, b2=b2_p,
                d_ff=d_ff, d_hid=d_hid, d_pad=d_pad, h_pad=h_pad)


# --------------------------------------------------------------------------
# Forward pass
# --------------------------------------------------------------------------
def feed_forward(x, params, *, tb=None, out_dtype=None):
    """x: (B, d_ff) -> softmax(relu(x @ W1 + b1) @ W2 + b2), shape (B, d_ff)."""
    B, d_ff = x.shape
    assert d_ff == params["d_ff"], "feature dim mismatch with prepared params"
    d_pad, h_pad = params["d_pad"], params["h_pad"]

    out_dtype = jnp.dtype(out_dtype) if out_dtype is not None else jnp.dtype(x.dtype)
    out_bytes = out_dtype.itemsize
    tile_rows = 16 if out_dtype == jnp.bfloat16 else 8  # bf16 needs (16,128) tiles

    # Batch row-tile: big enough to feed the MXU (default 256), but at least
    # 2 grid steps when the batch permits so the "parallel" axis spans both
    # v7x TensorCores.
    if tb is None:
        tb = 256
    tb = min(tb, _round_up(B, tile_rows))
    tb = max(tile_rows, _round_up(tb, tile_rows))
    if B >= 2 * tile_rows and _round_up(B, tb) // tb < 2:
        tb = _round_up((B + 1) // 2, tile_rows)
    B_pad = _round_up(B, tb)

    # Generation-aware VMEM plan.
    cap = _vmem_capacity()
    budget = int(0.70 * cap)
    hc, single_buffer = _choose_hidden_plan(tb, d_pad, h_pad, out_bytes, budget)
    need = _vmem_need(tb, d_pad, hc, out_bytes, 1 if single_buffer else 2)
    vmem_limit = int(max(16 << 20, min(int(0.75 * cap), need + (8 << 20))))

    # Activation layout plumbing (cheap; weights were prepared at load time).
    x_p = x.astype(jnp.bfloat16) if x.dtype != jnp.bfloat16 else x
    if (B_pad, d_pad) != (B, d_ff):
        x_p = jnp.pad(x_p, ((0, B_pad - B), (0, d_pad - d_ff)))

    call = _make_call(B_pad, d_pad, h_pad, hc, tb, out_dtype.name,
                      single_buffer, vmem_limit)
    out_p = call(x_p, params["w1"], params["b1"], params["w2"], params["b2"])
    return out_p[:B, :d_ff]


# --------------------------------------------------------------------------
# Demo / correctness check
# --------------------------------------------------------------------------
if __name__ == "__main__":
    d_ff = 32
    batch = 16  # small demo; yields a 2-step batch grid (8-row tiles)

    key = jax.random.PRNGKey(0)
    kx, k1, k2, k3, k4 = jax.random.split(key, 5)

    x = jax.random.normal(kx, (batch, d_ff), dtype=jnp.float32)

    # PyTorch-Linear-like uniform init (deterministic).
    lim1 = 1.0 / (d_ff ** 0.5)
    lim2 = 1.0 / ((2 * d_ff) ** 0.5)
    w1 = jax.random.uniform(k1, (d_ff, 2 * d_ff), jnp.float32, -lim1, lim1)
    b1 = jax.random.uniform(k2, (2 * d_ff,), jnp.float32, -lim1, lim1)
    w2 = jax.random.uniform(k3, (2 * d_ff, d_ff), jnp.float32, -lim2, lim2)
    b2 = jax.random.uniform(k4, (d_ff,), jnp.float32, -lim2, lim2)

    params = prepare_ff_params(w1, b1, w2, b2)   # once, at load time
    out = jax.block_until_ready(feed_forward(x, params))

    # Pure-JAX f32 reference (kernel uses bf16 matmul operands + approx
    # reciprocal, so tolerances are loosened accordingly).
    ref_h = jnp.maximum(x @ w1 + b1, 0.0)
    ref_y = ref_h @ w2 + b2
    ref = jax.nn.softmax(ref_y, axis=-1)

    assert out.shape == (batch, d_ff), f"bad shape {out.shape}"
    assert jnp.allclose(out, ref, atol=2e-2, rtol=2e-2), "mismatch vs reference"
    assert jnp.allclose(jnp.sum(out, axis=-1), 1.0, atol=1e-2), "rows must sum to ~1"

    print("KERNEL_OK")
</pallas_src>

<mosaic_0001>
module attributes {stable_mosaic.version = 11 : i64} {
  func.func @_ff_kernel(%arg0: i32, %arg1: i32, %arg2: memref<8x128xbf16, #tpu.memory_space<vmem>>, %arg3: memref<128x128xbf16, #tpu.memory_space<vmem>>, %arg4: memref<1x128xf32, #tpu.memory_space<vmem>>, %arg5: memref<128x128xbf16, #tpu.memory_space<vmem>>, %arg6: memref<1x128xf32, #tpu.memory_space<vmem>>, %arg7: memref<8x128xf32, #tpu.memory_space<vmem>>, %arg8: memref<8x128xf32, #tpu.memory_space<vmem>>) attributes {dimension_semantics = [#tpu.dimension_semantics<parallel>, #tpu.dimension_semantics<arbitrary>], iteration_bounds = array<i64: 2, 1>, scalar_prefetch = 0 : i64, scratch_operands = 1 : i64, tpu.core_type = #tpu.core_type<tc>, window_params = [{transform_indices = @transform_0, window_bounds = array<i64: 8, 128>}, {transform_indices = @transform_1, window_bounds = array<i64: 128, 128>}, {transform_indices = @transform_2, window_bounds = array<i64: 1, 128>}, {transform_indices = @transform_3, window_bounds = array<i64: 128, 128>}, {pipeline_mode = #tpu.pipeline_mode<synchronous>, transform_indices = @transform_4, window_bounds = array<i64: 1, 128>}, {transform_indices = @transform_5, window_bounds = array<i64: 8, 128>}]} {
    %c0_i32 = arith.constant 0 : i32
    %0 = arith.cmpi eq, %arg1, %c0_i32 : i32
    %1 = arith.extui %0 : i1 to i32
    %c0_i32_0 = arith.constant 0 : i32
    %2 = arith.cmpi ne, %1, %c0_i32_0 : i32
    scf.if %2 {
      %cst_16 = arith.constant 0.000000e+00 : f32
      %20 = vector.broadcast %cst_16 : f32 to vector<8x128xf32>
      %c0_17 = arith.constant 0 : index
      %c0_18 = arith.constant 0 : index
      %21 = vector.load %arg8[%c0_17, %c0_18] : memref<8x128xf32, #tpu.memory_space<vmem>>, vector<8x128xf32>
      tpu.vector_store %arg8[%c0_17, %c0_18], %20 {strides = array<i32>} : memref<8x128xf32, #tpu.memory_space<vmem>>, vector<8x128xf32>,
    } else {
    }
    %c0 = arith.constant 0 : index
    %c0_1 = arith.constant 0 : index
    %3 = vector.load %arg2[%c0, %c0_1] : memref<8x128xbf16, #tpu.memory_space<vmem>>, vector<8x128xbf16>
    %c0_2 = arith.constant 0 : index
    %c0_3 = arith.constant 0 : index
    %4 = vector.load %arg3[%c0_2, %c0_3] : memref<128x128xbf16, #tpu.memory_space<vmem>>, vector<128x128xbf16>
    %cst = arith.constant dense<0.000000e+00> : vector<8x128xf32>
    %5 = tpu.matmul %3, %4, %cst {dimension_numbers = #tpu.dot_dimension_numbers<[1], [0], [0], [1], [0, 0, 1, 1], [], []>} : vector<8x128xbf16>, vector<128x128xbf16>, vector<8x128xf32> -> vector<8x128xf32>
    %c0_4 = arith.constant 0 : index
    %c0_5 = arith.constant 0 : index
    %6 = vector.load %arg4[%c0_4, %c0_5] : memref<1x128xf32, #tpu.memory_space<vmem>>, vector<1x128xf32>
    %7 = vector.broadcast %6 : vector<1x128xf32> to vector<8x128xf32>
    %8 = arith.addf %5, %7 : vector<8x128xf32>
    %cst_6 = arith.constant 0.000000e+00 : f32
    %9 = vector.broadcast %cst_6 : f32 to vector<8x128xf32>
    %10 = arith.maximumf %8, %9 : vector<8x128xf32>
    %c0_7 = arith.constant 0 : index
    %c0_8 = arith.constant 0 : index
    %11 = vector.load %arg8[%c0_7, %c0_8] : memref<8x128xf32, #tpu.memory_space<vmem>>, vector<8x128xf32>
    %12 = arith.truncf %10 : vector<8x128xf32> to vector<8x128xbf16>
    %c0_9 = arith.constant 0 : index
    %c0_10 = arith.constant 0 : index
    %13 = vector.load %arg5[%c0_9, %c0_10] : memref<128x128xbf16, #tpu.memory_space<vmem>>, vector<128x128xbf16>
    %cst_11 = arith.constant dense<0.000000e+00> : vector<8x128xf32>
    %14 = tpu.matmul %12, %13, %cst_11 {dimension_numbers = #tpu.dot_dimension_numbers<[1], [0], [0], [1], [0, 0, 1, 1], [], []>} : vector<8x128xbf16>, vector<128x128xbf16>, vector<8x128xf32> -> vector<8x128xf32>
    %15 = arith.addf %11, %14 : vector<8x128xf32>
    %c0_12 = arith.constant 0 : index
    %c0_13 = arith.constant 0 : index
    %16 = vector.load %arg8[%c0_12, %c0_13] : memref<8x128xf32, #tpu.memory_space<vmem>>, vector<8x128xf32>
    tpu.vector_store %arg8[%c0_12, %c0_13], %15 {strides = array<i32>} : memref<8x128xf32, #tpu.memory_space<vmem>>, vector<8x128xf32>,
    %c0_i32_14 = arith.constant 0 : i32
    %17 = arith.cmpi eq, %arg1, %c0_i32_14 : i32
    %18 = arith.extui %17 : i1 to i32
    %c0_i32_15 = arith.constant 0 : i32
    %19 = arith.cmpi ne, %18, %c0_i32_15 : i32
    scf.if %19 {
      %c0_16 = arith.constant 0 : index
      %c0_17 = arith.constant 0 : index
      %20 = vector.load %arg8[%c0_16, %c0_17] : memref<8x128xf32, #tpu.memory_space<vmem>>, vector<8x128xf32>
      %c0_18 = arith.constant 0 : index
      %c0_19 = arith.constant 0 : index
      %21 = vector.load %arg6[%c0_18, %c0_19] : memref<1x128xf32, #tpu.memory_space<vmem>>, vector<1x128xf32>
      %22 = vector.broadcast %21 : vector<1x128xf32> to vector<8x128xf32>
      %23 = arith.addf %20, %22 : vector<8x128xf32>
      %cst_20 = arith.constant dense<0xFF800000> : vector<8xf32>
      %24 = vector.multi_reduction <maximumf>, %23, %cst_20 [1] : vector<8x128xf32> to vector<8xf32>
      %25 = vector.shape_cast %24 : vector<8xf32> to vector<8x1xf32>
      %26 = vector.broadcast %25 : vector<8x1xf32> to vector<8x128xf32>
      %27 = arith.subf %23, %26 : vector<8x128xf32>
      %28 = math.exp %27 : vector<8x128xf32>
      %cst_21 = arith.constant dense<0.000000e+00> : vector<8xf32>
      %29 = vector.multi_reduction <add>, %28, %cst_21 [1] : vector<8x128xf32> to vector<8xf32>
      %30 = vector.shape_cast %29 : vector<8xf32> to vector<8x1xf32>
      %31 = tpu.reciprocal %30 {approx = true} : vector<8x1xf32> -> vector<8x1xf32>
      %32 = vector.broadcast %31 : vector<8x1xf32> to vector<8x128xf32>
      %33 = arith.mulf %28, %32 : vector<8x128xf32>
      %c0_22 = arith.constant 0 : index
      %c0_23 = arith.constant 0 : index
      %34 = vector.load %arg7[%c0_22, %c0_23] : memref<8x128xf32, #tpu.memory_space<vmem>>, vector<8x128xf32>
      tpu.vector_store %arg7[%c0_22, %c0_23], %33 {strides = array<i32>} : memref<8x128xf32, #tpu.memory_space<vmem>>, vector<8x128xf32>,
    } else {
    }
    return
  }
  func.func @transform_0(%arg0: i32, %arg1: i32) -> (i32, i32) {
    %c0_i32 = arith.constant 0 : i32
    %c0_i32_0 = arith.constant 0 : i32
    return %arg0, %c0_i32 : i32, i32
  }
  func.func @transform_1(%arg0: i32, %arg1: i32) -> (i32, i32) {
    %c0_i32 = arith.constant 0 : i32
    %c0_i32_0 = arith.constant 0 : i32
    return %c0_i32, %arg1 : i32, i32
  }
  func.func @transform_2(%arg0: i32, %arg1: i32) -> (i32, i32) {
    %c0_i32 = arith.constant 0 : i32
    %c0_i32_0 = arith.constant 0 : i32
    return %c0_i32, %arg1 : i32, i32
  }
  func.func @transform_3(%arg0: i32, %arg1: i32) -> (i32, i32) {
    %c0_i32 = arith.constant 0 : i32
    %c0_i32_0 = arith.constant 0 : i32
    return %arg1, %c0_i32 : i32, i32
  }
  func.func @transform_4(%arg0: i32, %arg1: i32) -> (i32, i32) {
    %c0_i32 = arith.constant 0 : i32
    %c0_i32_0 = arith.constant 0 : i32
    %c0_i32_1 = arith.constant 0 : i32
    return %c0_i32, %c0_i32_0 : i32, i32
  }
  func.func @transform_5(%arg0: i32, %arg1: i32) -> (i32, i32) {
    %c0_i32 = arith.constant 0 : i32
    %c0_i32_0 = arith.constant 0 : i32
    return %arg0, %c0_i32 : i32, i32
  }
}

</mosaic_0001>

<bundles_post_ra>
// kernel: tpu_custom_call.1
= control target key start
LH: loop header
LB: loop body
LE: loop exit
PB: predicated region body
PF: predicated region fallthrough
CT: control target
= control target key end

     0   :  { %s1276_s0 = inlined_call_operand.hbm [shape: bf16[16,128], index: 0, kind: input, shape index: {}]   ;;  %s1277_s1 = inlined_call_operand.hbm [shape: bf16[128,128], index: 1, kind: input, shape index: {}]   ;;  %s1278_s2 = inlined_call_operand.vmem [shape: f32[1,128], index: 2, kind: input, shape index: {}]   ;;  %s1279_s3 = inlined_call_operand.hbm [shape: bf16[128,128], index: 3, kind: input, shape index: {}]   ;;  %s1280_s4 = inlined_call_operand.vmem [shape: f32[1,128], index: 4, kind: input, shape index: {}]   ;;  %s1281_s5 = inlined_call_operand.hbm [shape: f32[16,128], index: 5, kind: output, shape index: {}]  }
   0x1   :  { %1285 = sst [smem:[#allocation13_spill]] %s1277_s1 }
   0x2   :  { %10 = vsyncpa [#allocation4], 0 }
   0x3   :  { %12 = vsyncpa [#allocation4 + $0x1], 0 }
   0x4   :  { %13 = vsyncpa [#allocation7], 0 }
   0x5   :  { %14 = vsyncpa [#allocation5], 0 }
   0x6   :  { %16 = vsyncpa [#allocation5 + $0x1], 0  ;;  %s1092_s18 = smov 0   ;;  %s1094_s19 = smov 0  }
   0x7   :  { %s1096_s20 = smov 0   ;;  %s1098_s21 = smov 0  }
   0x8   :  { %s1100_s22 = smov 0   ;;  %s1102_s23 = smov 0  }
   0x9 LB: > { %s687_s24 = sadd.s32 4294967295, %s1052_s23   ;;  %s688_s25 = sadd.s32 4294967294, %s1052_s23   ;;  %s1052_s23 = sphi %s1102_s23, %s22_s23   ;;  %s1048_s22 = sphi %s1100_s22, %s1303_s22   ;;  %s1044_s21 = sphi %s1098_s21, %s1302_s21   ;;  %s1040_s20 = sphi %s1096_s20, %s1301_s20   ;;  %s1036_s19 = sphi %s1094_s19, %s1300_s19   ;;  %s1032_s18 = sphi %s1092_s18, %s1299_s18  }
   0xa   : > { %p54_p0 = scmp.ne.s32.totalorder %s1036_s19, %s1032_s18  ;;  %p1126_p1 = scmp.eq.s32.totalorder %s687_s24, 0 }
   0xb   : > { %p1130_p2 = scmp.eq.s32.totalorder %s687_s24, 1  ;;  %p183_p3 = scmp.eq.s32.totalorder %s688_s25, 1 }
   0xc   : > { %s1286_s26 = scalar_select %p1126_p1, 1, 0 }
   0xd   : > { %p1136_p4 = por %p1126_p1, %p54_p0  ;;  %p689_p5 = scmp.ge.s32.totalorder %s1052_s23, 1 }
   0xe   : > { %p1141_p6 = por %p183_p3, %p54_p0  ;;  %p190_p7 = scmp.lt.s32.totalorder %s1052_s23, 3 }
   0xf   : > { %s1288_s28 = scalar_select %p1136_p4, 1, 0 }
  0x10   : > { %s1289_s29 = scalar_select %p1141_p6, 1, 0 }
  0x11   : > { %p1146_p8 = pnand %p689_p5, %p190_p7  ;;  %s1054_s6 = smov [#allocation6]  }
  0x12   : > { %s204_s7 = sshll.u32 %s1054_s6, 4  ;;  %s1055_s9 = smov [#allocation8]   ;;  %s205_s7 = int_to_ptr.vmem [resolvable:$true] %s204_s7 }
  0x13   : > { %p793_p9 = pneg %p1146_p8  ;;  %s226_s10 = sshll.u32 %s1055_s9, 4  ;;  %s227_s10 = int_to_ptr.vmem [resolvable:$true] %s226_s10 }
  0x14   : > { %s899_s11 = scalar_lea.vmem %s205_s7, 1024  ;;  %p907_p5 = scmp.lt.s32.totalorder %s205_s7, %s205_s7 }
  0x15   : > { %p1155_p11 = pnand %p793_p9, %p1126_p1  ;;  %p900_p13 = scmp.ne.s32.totalorder %s205_s7, %s899_s11 }
  0x16   : > { %p908_p7 = scmp.lt.s32.totalorder %s899_s11, %s899_s11 }
  0x17   : > { %p890_p12 = pneg %p1155_p11 }
  0x18   : > { %p909_p10 = por %p908_p7, %p907_p5 }
  0x19   : > { %p902_p0 = pnand %p900_p13, %p890_p12 }
  0x1b   : > { %p903_p3 = pneg %p902_p0 }
  0x1d   : > { %p910_p9 = pnand %p909_p10, %p903_p3 }
  0x1f   : > { %913 = shalt.err (!%p910_p9)
}
  0x20   : > { %s1056_s12 = smov 64   ;;  %s1057_s13 = smov 4  }
  0x21   : > { %s1292_s1 = sld [smem:[#allocation13_spill]]  ;;  %s925_s16 = scalar_lea.vmem %s227_s10, 1024 }
  0x22   : > { %p926_p6 = scmp.ne.s32.totalorder %s227_s10, %s925_s16  ;;  %p933_p1 = scmp.lt.s32.totalorder %s227_s10, %s227_s10 }
  0x23   : > { %p934_p4 = scmp.lt.s32.totalorder %s925_s16, %s925_s16 }
  0x24   : > { %p928_p13 = pnand %p926_p6, %p890_p12 }
  0x25   : > { %p935_p5 = por %p934_p4, %p933_p1 }
  0x26   : > { %p929_p0 = pneg %p928_p13 }
  0x27   : > { %796 = dma.hbm_to_vmem [thread:$0]  (!%p1155_p11), %s1292_s1, 1024, %s205_s7, [#allocation7], %s1056_s12, %s1056_s12, %s1057_s13  }
  0x28   : > { %p936_p10 = pnand %p935_p5, %p929_p0 }
  0x2a   : > { %939 = shalt.err (!%p936_p10)
}
  0x2b   : > { %799 = dma.hbm_to_vmem [thread:$0]  (!%p1155_p11), %s1279_s3, 1024, %s227_s10, [#allocation7], %s1056_s12, %s1056_s12, %s1057_s13  }
  0x2c   : > { %s34_s25 = sadd.s32 1, %s1048_s22  ;;  %s41_s6 = sadd.s32 1, %s1040_s20 }
  0x2d   : > { %p36_p1 = scmp.ge.s32.totalorder %s34_s25, 2  ;;  %p48_p4 = scmp.ne.s32.totalorder %s1040_s20, %s1036_s19 }
  0x2e   : > { %p49_p6 = scmp.eq.s32.totalorder %s1052_s23, 0  ;;  %p810_p12 = scmp.lt.s32.totalorder %s1052_s23, 2 }
  0x2f   : > { %s1305_s25 = smov (%p36_p1, %s34_s25), 0  ;;  %p1187_p7 = por %p1130_p2, %p48_p4 }
  0x30   : > { %p50_p3 = por %p49_p6, %p48_p4  ;;  %s38_s8 = ssub.s32 %s1048_s22, %s1305_s25 }
  0x31   : > { %s243_s9 = sand.u32 1, %s1040_s20   ;;  %p39_p9 = scmp.eq.s32.totalorder %s38_s8, 0 }
  0x32   : > { %s694_s10 = sshll.u32 %s243_s9, 2  ;;  %s695_s11 = sshll.u32 %s1048_s22, 6 }
  0x33   : > { %s1196_s12 = scalar_select %p39_p9, %s1040_s20, %s41_s6  }
  0x34   : > { %s252_s15 = scalar_lea.hbm %s1276_s0, %s695_s11  ;;  %s247_s16 = scalar_lea.vmem [#allocation3], %s694_s10 }
  0x35   : > { %s254_s17 = sshll.u32 %s247_s16, 4  ;;  %p1203_p11 = pnand %p810_p12, %p50_p3  ;;  %s255_s17 = int_to_ptr.vmem [resolvable:$true] %s254_s17 }
  0x36   : > { %s244_s24 = scalar_lea.sflag [#allocation4], %s243_s9  ;;  %s953_s8 = scalar_lea.vmem %s255_s17, 64 }
  0x37   : > { %p942_p2 = pneg %p1203_p11  ;;  %p954_p13 = scmp.ne.s32.totalorder %s255_s17, %s953_s8 }
  0x38   : > { %s1058_s6 = smov [#allocation3]  }
  0x39   : > { %p956_p0 = pnand %p954_p13, %p942_p2  ;;  %s958_s1 = sshll.u32 %s1058_s6, 4  ;;  %s959_s1 = int_to_ptr.vmem [resolvable:$false] %s958_s1 }
  0x3a   : > { %s960_s11 = scalar_lea.vmem %s959_s1, 128  ;;  %p961_p10 = scmp.lt.s32.totalorder %s255_s17, %s959_s1 }
  0x3b   : > { %p957_p5 = pneg %p956_p0  ;;  %p962_p1 = scmp.lt.s32.totalorder %s960_s11, %s953_s8 }
  0x3d   : > { %p963_p4 = por %p962_p1, %p961_p10 }
  0x3f   : > { %p964_p6 = pnand %p963_p4, %p957_p5 }
  0x41   : > { %967 = shalt.err (!%p964_p6)
}
  0x42   : > { %803 = dma.hbm_to_vmem [thread:$0]  (!%p1203_p11), %s252_s15, 64, %s255_s17, %s244_s24  }
  0x43   : > { %263 = sbr.rel (%p1146_p8) target bundleno = 827 (0x33b), region = 40  ;;  %s1214_s9 = sand.u32 (!%p1146_p8), 1, %s1036_s19  }
  0x44   : > { %s697_s10 = sshll.u32 (!%p1146_p8), %s1214_s9, 2  ;;  %s266_s13 = scalar_lea.sflag (!%p1146_p8), [#allocation4], %s1214_s9 }
  0x45   : > { %s1218_s14 = scalar_lea.vmem (!%p1146_p8), [#allocation3], %s697_s10  ;;  %p1295_p12 = scmp.ne.s32.totalorder (!%p1146_p8), %s1288_s28, 0 }
  0x48   : > { %1019 = dma.done.wait (%p1295_p12), %s266_s13, 64  }
  0x49   : > { %1021 = vsyncadd (%p1295_p12), %s266_s13, 4294967232  ;;  %p1296_p3 = scmp.ne.s32.totalorder %s1286_s26, 0 }
  0x4b   : > { %1023 = dma.done.wait (%p1296_p3), [#allocation7], 2048  }
  0x4c   : > { %1025 = vsyncadd (%p1296_p3), [#allocation7], 4294965248  ;;  %v1059_v0 = vmov 0.0   ;;  %vm1060_vm0 = vmmov 0   ;;  %v868_v1 = vld [vmem:[#allocation6 + $0x38] sm:$0xff]   ;;  %v869_v2 = vld [vmem:[#allocation6 + $0x30] sm:$0xff]  }
  0x4d   : > { %741 = vmatprep.subr.bf16.mxu0 %v1059_v0  ;;  %757 = vmatprep.mubr.msk.bf16.mxu0 %vm1060_vm0, %v1059_v0  ;;  %v870_v3 = vld [vmem:[#allocation6 + $0x28] sm:$0xff]   ;;  %v876_v4 = vld [vmem:[#allocation8 + $0x38] sm:$0xff]   ;;  %v871_v5 = vld [vmem:[#allocation6 + $0x20] sm:$0xff]   ;;  %s700_s15 = sshll.u32 %s1214_s9, 3  ;;  %s720_s16 = sshll.u32 %s1044_s21, 7 }
  0x4e   : > { %761 = vmatprep.subr.bf16.mxu1 %v1059_v0  ;;  %777 = vmatprep.mubr.msk.bf16.mxu1 %vm1060_vm0, %v1059_v0  ;;  %v877_v6 = vld [vmem:[#allocation8 + $0x30] sm:$0xff]   ;;  %v872_v7 = vld [vmem:[#allocation6 + $0x18] sm:$0xff]   ;;  %v878_v8 = vld [vmem:[#allocation8 + $0x28] sm:$0xff]   ;;  %s306_s17 = scalar_lea.vmem [#allocation9], %s700_s15  ;;  %s572_s6 = scalar_lea.hbm %s1281_s5, %s720_s16 }
  0x4f   : > { %742 = vmatpush3.bf16.msra.mxu0 %v868_v1  ;;  %762 = vmatpush3.bf16.msra.mxu1 %v876_v4  ;;  %v873_v9 = vld [vmem:[#allocation6 + $0x10] sm:$0xff]   ;;  %v879_v10 = vld [vmem:[#allocation8 + $0x20] sm:$0xff]   ;;  %v874_v11 = vld [vmem:[#allocation6 + $0x8] sm:$0xff]   ;;  %s574_s27 = sshll.u32 %s306_s17, 4  ;;  %s561_s11 = scalar_lea.sflag [#allocation5], %s1214_s9  ;;  %s575_s27 = int_to_ptr.vmem [resolvable:$true] %s574_s27 }
  0x50   : > { %743 = vmatprep.subr.bf16.mxu0 %v1059_v0  ;;  %763 = vmatprep.subr.bf16.mxu1 %v1059_v0  ;;  %v880_v12 = vld [vmem:[#allocation8 + $0x18] sm:$0xff]   ;;  %v875_v13 = vld [vmem:[#allocation6] sm:$0xff]   ;;  %v881_v14 = vld [vmem:[#allocation8 + $0x10] sm:$0xff]   ;;  %s968_s10 = scalar_lea.vmem %s575_s27, 128  ;;  %s1061_s13 = smov [#allocation9]  }
  0x51   : > { %v317_v15 = vld [vmem:[%s1218_s14] sm:$0xf]  ;;  %v882_v16 = vld [vmem:[#allocation8 + $0x8] sm:$0xff]   ;;  %v883_v17 = vld [vmem:[#allocation8] sm:$0xff]   ;;  %p969_p8 = scmp.ne.s32.totalorder %s575_s27, %s968_s10  ;;  %s972_s14 = sshll.u32 %s1061_s13, 4  ;;  %s973_s14 = int_to_ptr.vmem [resolvable:$false] %s972_s14 }
  0x52   : > { %v701_v18 = vld [vmem:[%s1278_s2] ss:$0 sm:$0xff]  ;;  %s974_s21 = scalar_lea.vmem %s973_s14, 256  ;;  %p975_p2 = scmp.lt.s32.totalorder %s575_s27, %s973_s14 }
  0x53   : > { %744 = vmatpush3.bf16.msra.mxu0 %v869_v2  ;;  %764 = vmatpush3.bf16.msra.mxu1 %v877_v6  ;;  %v718_v26 = vld [vmem:[%s1280_s4] ss:$0 sm:$0xff]  ;;  %p970_p9 = pnand %p969_p8, %p1187_p7  ;;  %p976_p13 = scmp.lt.s32.totalorder %s974_s21, %s968_s10 }
  0x54   : > { %745 = vmatprep.subr.bf16.mxu0 %v1059_v0  ;;  %765 = vmatprep.subr.bf16.mxu1 %v1059_v0 }
  0x55   : > { %p971_p11 = pneg %p970_p9  ;;  %p977_p0 = por %p976_p13, %p975_p2 }
  0x57   : > { %746 = vmatpush3.bf16.msra.mxu0 %v870_v3  ;;  %766 = vmatpush3.bf16.msra.mxu1 %v878_v8  ;;  %p978_p5 = pnand %p977_p0, %p971_p11 }
  0x58   : > { %747 = vmatprep.subr.bf16.mxu0 %v1059_v0  ;;  %767 = vmatprep.subr.bf16.mxu1 %v1059_v0 }
  0x5b   : > { %748 = vmatpush3.bf16.msra.mxu0 %v871_v5  ;;  %768 = vmatpush3.bf16.msra.mxu1 %v879_v10 }
  0x5c   : > { %749 = vmatprep.subr.bf16.mxu0 %v1059_v0  ;;  %769 = vmatprep.subr.bf16.mxu1 %v1059_v0 }
  0x5f   : > { %750 = vmatpush3.bf16.msra.mxu0 %v872_v7  ;;  %770 = vmatpush3.bf16.msra.mxu1 %v880_v12 }
  0x60   : > { %751 = vmatprep.subr.bf16.mxu0 %v1059_v0  ;;  %771 = vmatprep.subr.bf16.mxu1 %v1059_v0 }
  0x63   : > { %752 = vmatpush3.bf16.msra.mxu0 %v873_v9  ;;  %772 = vmatpush3.bf16.msra.mxu1 %v881_v14 }
  0x64   : > { %753 = vmatprep.subr.bf16.mxu0 %v1059_v0  ;;  %773 = vmatprep.subr.bf16.mxu1 %v1059_v0 }
  0x67   : > { %754 = vmatpush3.bf16.msra.mxu0 %v874_v11  ;;  %774 = vmatpush3.bf16.msra.mxu1 %v882_v16 }
  0x68   : > { %755 = vmatprep.subr.bf16.mxu0 %v1059_v0  ;;  %775 = vmatprep.subr.bf16.mxu1 %v1059_v0 }
  0x6b   : > { %756 = vmatpush3.bf16.msra.mxu0 %v875_v13  ;;  %776 = vmatpush3.bf16.msra.mxu1 %v883_v17 }
  0x6e   : > { %758 = vmatmul.mubr.bf16.vlgmr.msra.gmra.mxu0 %v317_v15 }
 0x12e   : > { %v423_v19 = vpop.f32.mrf.mxu0 }
 0x12f   : > { %v424_v20 = vadd.f32 %v701_v18, %v423_v19 }
 0x130   : > { %v759_v21 = vpop.f32.mrf.mxu0 }
 0x131   : > { %v429_v22 = vmax.f32 %v424_v20, 0.0 }
 0x132   : > { %v426_v23 = vpop.f32.mrf.mxu0 }
 0x133   : > { %v431_v24 = vpack.c.bf16 %v429_v22, %v429_v22 }
 0x134   : > { %v760_v25 = vpop.f32.mrf.mxu0 }
 0x135   : > { %778 = vmatmul.mubr.bf16.vlgmr.msra.gmra.mxu1 %v431_v24 }
 0x1f5   : > { %v530_v27 = vpop.f32.mrf.mxu1 }
 0x1f6   : > { %v549_v28 = vadd.f32 %v718_v26, %v530_v27 }
 0x1f7   : > { %v779_v29 = vpop.f32.mrf.mxu1 }
 0x1f8   : > { %550 = vmax.xlane.f32.xlu0 %v549_v28 }
 0x1f9   : > { %v533_v30 = vpop.f32.mrf.mxu1 }
 0x1fb   : > { %v780_v31 = vpop.f32.mrf.mxu1 }
 0x281   : > { %v551_v32 = vpop.xlane.xlu0 %550 }
 0x282   : > { %v552_v33 = vsub.f32 %v549_v28, %v551_v32 }
 0x284   : > { %v553_v34 = vmul.f32 1.442695, %v552_v33 }
 0x286   : > { %884 = vpow2.f32 %v553_v34 }
 0x293   : > { %v885_v35 = vpop.eup %884 }
 0x294   : > { %555 = vadd.xlane.f32.xlu0 %v885_v35 }
 0x31d   : > { %v556_v36 = vpop.xlane.xlu0 %555 }
 0x31e   : > { %886 = vrcp.f32 %v556_v36 }
 0x32b   : > { %v887_v37 = vpop.eup %886 }
 0x32c   : > { %v558_v38 = vmul.f32 %v887_v37, %v885_v35 }
 0x32e   : > { %559 = vst [vmem:[%s306_s17] sm:$0xff] %v558_v38 }
 0x32f   : > { %981 = shalt.err (!%p978_p5)
}
 0x330   : > { %s982_s1 = scalar_lea.hbm %s572_s6, 128  ;;  %s986_s28 = scalar_lea.hbm %s1281_s5, 256 }
 0x331   : > { %p983_p10 = scmp.ne.s32.totalorder %s572_s6, %s982_s1  ;;  %p987_p6 = scmp.lt.s32.totalorder %s572_s6, %s1281_s5 }
 0x332   : > { %p988_p12 = scmp.lt.s32.totalorder %s986_s28, %s982_s1 }
 0x333   : > { %p984_p1 = pnand %p983_p10, %p1187_p7 }
 0x334   : > { %p989_p3 = por %p988_p12, %p987_p6 }
 0x335   : > { %p985_p4 = pneg %p984_p1 }
 0x337   : > { %p990_p8 = pnand %p989_p3, %p985_p4 }
 0x339   : > { %993 = shalt.err (!%p990_p8)
}
 0x33a   : > { %791 = dma.vmem_to_hbm [thread:$0]  (%p1187_p7), %s575_s27, 128, %s572_s6, %s561_s11  }
 0x33b PF: > { %s586_s16 = sand.u32 1, %s1032_s18   ;;  %p1297_p9 = scmp.ne.s32.totalorder %s1289_s29, 0 }
 0x33c   : > { %p1298_p11 = scmp.ge.s32.totalorder %s1052_s23, 2  ;;  %s587_s17 = scalar_lea.sflag [#allocation5], %s586_s16 }
 0x33e   : > { %p805_p2 = pnand %p1298_p11, %p1297_p9 }
 0x340   : > { %p806_p13 = pneg %p805_p2 }
 0x342   : > { %1027 = dma.done.wait (%p806_p13), %s587_s17, 128  }
 0x343   : > { %1029 = vsyncadd (%p806_p13), %s587_s17, 4294967168  ;;  %s22_s23 = sadd.s32 1, %s1052_s23   ;;  %s1299_s18 = smov %s1036_s19 }
 0x344   : > { %p19_p0 = scmp.ge.s32.totalorder %s22_s23, 4   ;;  %s1300_s19 = smov %s1040_s20 }
 0x345   : > { %s1301_s20 = smov %s1196_s12  ;;  %s1302_s21 = smov %s1048_s22 }
 0x346   : > { %s1303_s22 = smov %s1305_s25  ;;  %21 = sbr.rel (!%p19_p0) target bundleno = 9 (0x9), region = 106 }
 0x34b   :  { %592 = vsyncpa [#allocation4], 1 }
 0x34c   :  { %594 = vsyncpa [#allocation4 + $0x1], 1 }
 0x34d   :  { %595 = vsyncpa [#allocation7], 1 }
 0x34e   :  { %596 = vsyncpa [#allocation5], 1 }
 0x34f   :  { %598 = vsyncpa [#allocation5 + $0x1], 1 }

</bundles_post_ra>
